<compile_context>
chip_gen: v7x
topology: tpu7x:2x2x1
jax: 0.10.0
libtpu: 0.0.40
codegen_flags: <defaults>
</compile_context>

<pallas_src>
from functools import partial

import jax
import jax.numpy as jnp
import numpy as np
from jax.experimental import pallas as pl
from jax.experimental.pallas import tpu as pltpu


def trinet_kernel(x_ref, w1_ref, b1_ref, wh_ref, bh_ref, o_ref):
    # x_ref:  (TB, IN)   f32       -- batch tile (streamed, cast in-kernel)
    # w1_ref: (IN, HID)  bf16      -- shared trunk weight (resident)
    # b1_ref: (1, HID)   f32
    # wh_ref: (HID, OUT) bf16      -- pre-averaged head weight (resident)
    # bh_ref: (1, OUT)   f32       -- pre-averaged head bias
    # o_ref:  (TB, OUT)  f32       -- lane-dense (OUT = 128)

    # Shared trunk: Linear (bf16 MXU operands, f32 accumulation), then
    # bias + ReLU in f32 (v5e-friendly epilogue).
    x_bf = x_ref[...].astype(jnp.bfloat16)          # in-kernel cast (hidden under MXU)
    z = jnp.dot(x_bf, w1_ref[...], preferred_element_type=jnp.float32)
    z = jnp.maximum(z + b1_ref[...], 0.0)

    # Fused head: single matmul against the pre-averaged head weight.
    out = jnp.dot(z.astype(jnp.bfloat16), wh_ref[...],
                  preferred_element_type=jnp.float32) + bh_ref[...]
    o_ref[...] = out.astype(o_ref.dtype)


def prepare_params(w1, b1, ws, bs):
    """One-time parameter preparation (NOT on the per-forward hot path).

    Exact identity for the tri=False path:
        mean_i(z @ ws[i] + bs[i]) == z @ mean_i(ws[i]) + mean_i(bs[i])
    Also pre-casts the MXU operands to bf16 so the forward does no weight
    conversion work per call.
    """
    w_head = jnp.mean(ws, axis=0)                   # (HID, OUT)
    b_head = jnp.mean(bs, axis=0)                   # (1, OUT)
    return (w1.astype(jnp.bfloat16),
            b1.astype(jnp.float32),
            w_head.astype(jnp.bfloat16),
            b_head.astype(jnp.float32))


@partial(jax.jit, static_argnames=("tile_b",))
def tri_model_forward(x, w1_bf, b1_f, wh_bf, bh_f, *, tile_b=None):
    """Fused TriModel forward (tri=False path).

    x     : (B, IN)   f32  (cast to bf16 inside the kernel)
    w1_bf : (IN, HID) bf16     b1_f : (1, HID) f32
    wh_bf : (HID, OUT) bf16    bh_f : (1, OUT) f32   (pre-averaged, see prepare_params)
    returns (B, OUT) f32 == mean_i( relu(x @ w1 + b1) @ ws[i] + bs[i] )
    """
    B, IN = x.shape
    HID = w1_bf.shape[1]
    OUT = wh_bf.shape[1]

    if tile_b is None:
        # Largest tile that still leaves >= 2 grid steps: keeps BlockSpec
        # double-buffering and shards the batch across both v7x TensorCores.
        # On single-TC v5e/v6e, passing tile_b=B (grid of 1) is a valid sweep
        # point worth benchmarking.
        tile_b = min(512, max(B // 2, 8))
    assert B % tile_b == 0, "batch must be divisible by tile_b"

    grid = (B // tile_b,)
    return pl.pallas_call(
        trinet_kernel,
        out_shape=jax.ShapeDtypeStruct((B, OUT), jnp.float32),
        grid_spec=pl.GridSpec(
            grid=grid,
            in_specs=[
                pl.BlockSpec((tile_b, IN), lambda i: (i, 0)),   # x tile (streamed)
                pl.BlockSpec((IN, HID), lambda i: (0, 0)),      # trunk weight (resident)
                pl.BlockSpec((1, HID), lambda i: (0, 0)),       # trunk bias
                pl.BlockSpec((HID, OUT), lambda i: (0, 0)),     # averaged head weight
                pl.BlockSpec((1, OUT), lambda i: (0, 0)),       # averaged head bias
            ],
            out_specs=pl.BlockSpec((tile_b, OUT), lambda i: (i, 0)),
        ),
        compiler_params=pltpu.CompilerParams(
            # Batch axis is independent -> parallel (megacore / v7x two-TC).
            dimension_semantics=("parallel",),
            # Resident bf16 weights + double-buffered f32 x / f32 out tiles are
            # a few MiB at most -- far under every generation's VMEM.
            vmem_limit_bytes=32 * 1024 * 1024,
        ),
    )(x, w1_bf, b1_f, wh_bf, bh_f)


def tri_model_reference(x, w1, b1, ws, bs):
    """Original-semantics f32 reference: stack_mean of the 3 sub-model outputs."""
    z = jnp.maximum(x @ w1 + b1, 0.0)
    outs = jnp.stack([z @ ws[i] + bs[i] for i in range(3)], axis=0)
    return jnp.mean(outs, axis=0)  # stack_mean


if __name__ == "__main__":
    # Small but MXU/lane-aligned shapes: OUT = 128 (full-lane stores),
    # default tile_b -> grid of 2 (pipelined, both v7x TCs).
    B, IN, HID, OUT = 512, 256, 256, 128

    key = jax.random.PRNGKey(0)
    k_x, k_w1, k_b1, k_ws, k_bs = jax.random.split(key, 5)

    x = jax.random.normal(k_x, (B, IN), dtype=jnp.float32)
    # deterministic synthetic parameter init (no checkpoint load)
    w1 = jax.random.normal(k_w1, (IN, HID), dtype=jnp.float32) * 0.05
    b1 = jax.random.normal(k_b1, (1, HID), dtype=jnp.float32) * 0.05
    ws = jax.random.normal(k_ws, (3, HID, OUT), dtype=jnp.float32) * 0.05
    bs = jax.random.normal(k_bs, (3, 1, OUT), dtype=jnp.float32) * 0.05

    # One-time setup: head averaging + bf16 casts hoisted off the hot path.
    w1_bf, b1_f, wh_bf, bh_f = jax.block_until_ready(
        prepare_params(w1, b1, ws, bs))

    out = tri_model_forward(x, w1_bf, b1_f, wh_bf, bh_f)
    out = jax.block_until_ready(out)

    ref = tri_model_reference(x, w1, b1, ws, bs)
    # bf16 matmul operands (f32 accumulation) vs. the all-f32 reference:
    # expected relative error ~1%, compare at 3e-2.
    np.testing.assert_allclose(np.asarray(out), np.asarray(ref),
                               rtol=3e-2, atol=3e-2)

    # TODO(synk): the `tri=True` list path, get_losses, and pseudo_labeling are
    # training-time host-side logic around this forward; only the fused
    # tri=False hot path is a kernel (tri=True cannot average the head weights
    # and would need a 3-head variant emitting three outputs).
    print("KERNEL_OK")
</pallas_src>

<mosaic_0001>
module attributes {stable_mosaic.version = 11 : i64} {
  func.func @trinet_kernel(%arg0: i32, %arg1: memref<256x256xf32, #tpu.memory_space<vmem>>, %arg2: memref<256x256xbf16, #tpu.memory_space<vmem>>, %arg3: memref<1x256xf32, #tpu.memory_space<vmem>>, %arg4: memref<256x128xbf16, #tpu.memory_space<vmem>>, %arg5: memref<1x128xf32, #tpu.memory_space<vmem>>, %arg6: memref<256x128xf32, #tpu.memory_space<vmem>>) attributes {dimension_semantics = [#tpu.dimension_semantics<parallel>], iteration_bounds = array<i64: 2>, scalar_prefetch = 0 : i64, scratch_operands = 0 : i64, tpu.core_type = #tpu.core_type<tc>, window_params = [{transform_indices = @transform_0, window_bounds = array<i64: 256, 256>}, {pipeline_mode = #tpu.pipeline_mode<synchronous>, transform_indices = @transform_1, window_bounds = array<i64: 256, 256>}, {pipeline_mode = #tpu.pipeline_mode<synchronous>, transform_indices = @transform_2, window_bounds = array<i64: 1, 256>}, {pipeline_mode = #tpu.pipeline_mode<synchronous>, transform_indices = @transform_3, window_bounds = array<i64: 256, 128>}, {pipeline_mode = #tpu.pipeline_mode<synchronous>, transform_indices = @transform_4, window_bounds = array<i64: 1, 128>}, {transform_indices = @transform_5, window_bounds = array<i64: 256, 128>}]} {
    %c0 = arith.constant 0 : index
    %c0_0 = arith.constant 0 : index
    %0 = vector.load %arg1[%c0, %c0_0] : memref<256x256xf32, #tpu.memory_space<vmem>>, vector<256x256xf32>
    %1 = arith.truncf %0 : vector<256x256xf32> to vector<256x256xbf16>
    %c0_1 = arith.constant 0 : index
    %c0_2 = arith.constant 0 : index
    %2 = vector.load %arg2[%c0_1, %c0_2] : memref<256x256xbf16, #tpu.memory_space<vmem>>, vector<256x256xbf16>
    %cst = arith.constant dense<0.000000e+00> : vector<256x256xf32>
    %3 = tpu.matmul %1, %2, %cst {dimension_numbers = #tpu.dot_dimension_numbers<[1], [0], [0], [1], [0, 0, 1, 1], [], []>} : vector<256x256xbf16>, vector<256x256xbf16>, vector<256x256xf32> -> vector<256x256xf32>
    %c0_3 = arith.constant 0 : index
    %c0_4 = arith.constant 0 : index
    %4 = vector.load %arg3[%c0_3, %c0_4] : memref<1x256xf32, #tpu.memory_space<vmem>>, vector<1x256xf32>
    %5 = vector.broadcast %4 : vector<1x256xf32> to vector<256x256xf32>
    %6 = arith.addf %3, %5 : vector<256x256xf32>
    %cst_5 = arith.constant 0.000000e+00 : f32
    %7 = vector.broadcast %cst_5 : f32 to vector<256x256xf32>
    %8 = arith.maximumf %6, %7 : vector<256x256xf32>
    %9 = arith.truncf %8 : vector<256x256xf32> to vector<256x256xbf16>
    %c0_6 = arith.constant 0 : index
    %c0_7 = arith.constant 0 : index
    %10 = vector.load %arg4[%c0_6, %c0_7] : memref<256x128xbf16, #tpu.memory_space<vmem>>, vector<256x128xbf16>
    %cst_8 = arith.constant dense<0.000000e+00> : vector<256x128xf32>
    %11 = tpu.matmul %9, %10, %cst_8 {dimension_numbers = #tpu.dot_dimension_numbers<[1], [0], [0], [1], [0, 0, 1, 1], [], []>} : vector<256x256xbf16>, vector<256x128xbf16>, vector<256x128xf32> -> vector<256x128xf32>
    %c0_9 = arith.constant 0 : index
    %c0_10 = arith.constant 0 : index
    %12 = vector.load %arg5[%c0_9, %c0_10] : memref<1x128xf32, #tpu.memory_space<vmem>>, vector<1x128xf32>
    %13 = vector.broadcast %12 : vector<1x128xf32> to vector<256x128xf32>
    %14 = arith.addf %11, %13 : vector<256x128xf32>
    %c0_11 = arith.constant 0 : index
    %c0_12 = arith.constant 0 : index
    %15 = vector.load %arg6[%c0_11, %c0_12] : memref<256x128xf32, #tpu.memory_space<vmem>>, vector<256x128xf32>
    tpu.vector_store %arg6[%c0_11, %c0_12], %14 {strides = array<i32>} : memref<256x128xf32, #tpu.memory_space<vmem>>, vector<256x128xf32>,
    return
  }
  func.func @transform_0(%arg0: i32) -> (i32, i32) {
    %c0_i32 = arith.constant 0 : i32
    %c0_i32_0 = arith.constant 0 : i32
    return %arg0, %c0_i32 : i32, i32
  }
  func.func @transform_1(%arg0: i32) -> (i32, i32) {
    %c0_i32 = arith.constant 0 : i32
    %c0_i32_0 = arith.constant 0 : i32
    %c0_i32_1 = arith.constant 0 : i32
    return %c0_i32, %c0_i32_0 : i32, i32
  }
  func.func @transform_2(%arg0: i32) -> (i32, i32) {
    %c0_i32 = arith.constant 0 : i32
    %c0_i32_0 = arith.constant 0 : i32
    %c0_i32_1 = arith.constant 0 : i32
    return %c0_i32, %c0_i32_0 : i32, i32
  }
  func.func @transform_3(%arg0: i32) -> (i32, i32) {
    %c0_i32 = arith.constant 0 : i32
    %c0_i32_0 = arith.constant 0 : i32
    %c0_i32_1 = arith.constant 0 : i32
    return %c0_i32, %c0_i32_0 : i32, i32
  }
  func.func @transform_4(%arg0: i32) -> (i32, i32) {
    %c0_i32 = arith.constant 0 : i32
    %c0_i32_0 = arith.constant 0 : i32
    %c0_i32_1 = arith.constant 0 : i32
    return %c0_i32, %c0_i32_0 : i32, i32
  }
  func.func @transform_5(%arg0: i32) -> (i32, i32) {
    %c0_i32 = arith.constant 0 : i32
    %c0_i32_0 = arith.constant 0 : i32
    return %arg0, %c0_i32 : i32, i32
  }
}

</mosaic_0001>

<bundles_post_ra>
// kernel: tri_model_forward.1
= control target key start
LH: loop header
LB: loop body
LE: loop exit
PB: predicated region body
PF: predicated region fallthrough
CT: control target
= control target key end

     0   :  { %10 = vsyncpa [#allocation3], 0  ;;  %s2265_s0 = inlined_call_operand.hbm [shape: f32[512,256], index: 0, kind: input, shape index: {}]   ;;  %s2266_s1 = inlined_call_operand.hbm [shape: bf16[256,256], index: 1, kind: input, shape index: {}]   ;;  %s2267_s2 = inlined_call_operand.vmem [shape: f32[1,256], index: 2, kind: input, shape index: {}]   ;;  %s2268_s3 = inlined_call_operand.hbm [shape: bf16[256,128], index: 3, kind: input, shape index: {}]   ;;  %s2269_s4 = inlined_call_operand.vmem [shape: f32[1,128], index: 4, kind: input, shape index: {}]   ;;  %s2270_s5 = inlined_call_operand.hbm [shape: f32[512,128], index: 5, kind: output, shape index: {}]  }
   0x1   :  { %12 = vsyncpa [#allocation3 + $0x1], 0 }
   0x2   :  { %13 = vsyncpa [#allocation6], 0 }
   0x3   :  { %14 = vsyncpa [#allocation4], 0 }
   0x4   :  { %16 = vsyncpa [#allocation4 + $0x1], 0  ;;  %s1821_s18 = smov 0   ;;  %s1823_s19 = smov 0  }
   0x5   :  { %s1825_s20 = smov 0   ;;  %s1827_s21 = smov 0  }
   0x6 LB: > { %s1842_s22 = sadd.s32 4294967295, %s1777_s21   ;;  %s1299_s23 = sadd.s32 4294967294, %s1777_s21   ;;  %s1777_s21 = sphi %s1827_s21, %s2290_s21   ;;  %s1773_s20 = sphi %s1825_s20, %s2289_s20   ;;  %s1769_s19 = sphi %s1823_s19, %s2288_s19   ;;  %s1765_s18 = sphi %s1821_s18, %s2287_s18  }
   0x7   : > { %p42_p0 = scmp.ne.s32.totalorder %s1769_s19, %s1765_s18  ;;  %p2271_p1 = scmp.eq.s32.totalorder %s1842_s22, 0 }
   0x8   : > { %p156_p3 = scmp.eq.s32.totalorder %s1299_s23, 1  ;;  %p1300_p5 = scmp.ge.s32.totalorder %s1777_s21, 1 }
   0x9   : > { %p1851_p4 = por %p2271_p1, %p42_p0  ;;  %p163_p7 = scmp.lt.s32.totalorder %s1777_s21, 3 }
   0xa   : > { %p1856_p6 = por %p156_p3, %p42_p0  ;;  %s1779_s27 = smov [#allocation5]  }
   0xb   : > { %s2274_s24 = scalar_select %p1851_p4, 1, 0 }
   0xc   : > { %s2275_s25 = scalar_select %p1856_p6, 1, 0 }
   0xd   : > { %p1861_p8 = pnand %p1300_p5, %p163_p7  ;;  %s175_s28 = sshll.u32 %s1779_s27, 4  ;;  %s1865_s28 = int_to_ptr.vmem [resolvable:$true] %s175_s28 }
   0xe   : > { %s1780_s30 = smov [#allocation7]   ;;  %s1621_s9 = scalar_lea.hbm %s2266_s1, 4096 }
   0xf   : > { %p1494_p9 = pneg %p1861_p8  ;;  %s191_s6 = sshll.u32 %s1780_s30, 4  ;;  %s1876_s6 = int_to_ptr.vmem [resolvable:$true] %s191_s6 }
  0x10   : > { %p1622_p12 = scmp.ne.s32.totalorder %s2266_s1, %s1621_s9  ;;  %p1628_p5 = scmp.lt.u32.totalorder %s1621_s9, %s2266_s1 }
  0x11   : > { %p1872_p11 = pnand %p1494_p9, %p2271_p1 }
  0x13   : > { %p1623_p13 = pneg %p1872_p11 }
  0x15   : > { %p1624_p0 = pnand %p1623_p13, %p1622_p12 }
  0x17   : > { %p1625_p3 = pneg %p1624_p0 }
  0x19   : > { %p1630_p7 = pnand %p1628_p5, %p1625_p3 }
  0x1b   : > { %1633 = shalt.err (!%p1630_p7)
}
  0x1c   : > { %s1634_s14 = scalar_lea.vmem %s1865_s28, 4096  ;;  %p1642_p2 = scmp.lt.s32.totalorder %s1865_s28, %s1865_s28 }
  0x1d   : > { %p1635_p9 = scmp.ne.s32.totalorder %s1865_s28, %s1634_s14  ;;  %p1643_p12 = scmp.lt.s32.totalorder %s1634_s14, %s1634_s14 }
  0x1f   : > { %p1637_p10 = pnand %p1635_p9, %p1623_p13  ;;  %p1644_p0 = por %p1643_p12, %p1642_p2 }
  0x21   : > { %p1638_p1 = pneg %p1637_p10 }
  0x23   : > { %p1645_p6 = pnand %p1644_p0, %p1638_p1 }
  0x25   : > { %1648 = shalt.err (!%p1645_p6)
}
  0x26   : > { %s1781_s15 = smov 128   ;;  %s1782_s16 = smov 8  }
  0x27   : > { %1497 = dma.hbm_to_vmem [thread:$0]  (!%p1872_p11), %s2266_s1, 4096, %s1865_s28, [#allocation6], %s1781_s15, %s1781_s15, %s1782_s16  }
  0x28   : > { %s1649_s7 = scalar_lea.hbm %s2268_s3, 2048 }
  0x29   : > { %p1650_p2 = scmp.ne.s32.totalorder %s2268_s3, %s1649_s7  ;;  %p1656_p10 = scmp.lt.u32.totalorder %s1649_s7, %s2268_s3 }
  0x2b   : > { %p1652_p1 = pnand %p1650_p2, %p1623_p13 }
  0x2d   : > { %p1653_p6 = pneg %p1652_p1 }
  0x2f   : > { %p1658_p3 = pnand %p1656_p10, %p1653_p6 }
  0x31   : > { %1661 = shalt.err (!%p1658_p3)
}
  0x32   : > { %s1662_s28 = scalar_lea.vmem %s1876_s6, 2048  ;;  %p1670_p12 = scmp.lt.s32.totalorder %s1876_s6, %s1876_s6 }
  0x33   : > { %p1663_p5 = scmp.ne.s32.totalorder %s1876_s6, %s1662_s28  ;;  %p1671_p0 = scmp.lt.s32.totalorder %s1662_s28, %s1662_s28 }
  0x35   : > { %p1665_p7 = pnand %p1663_p5, %p1623_p13  ;;  %p1672_p2 = por %p1671_p0, %p1670_p12 }
  0x37   : > { %p1666_p9 = pneg %p1665_p7 }
  0x39   : > { %p1673_p1 = pnand %p1672_p2, %p1666_p9 }
  0x3b   : > { %1676 = shalt.err (!%p1673_p1)
}
  0x3c   : > { %s1783_s12 = smov 64   ;;  %s1784_s13 = smov 4  }
  0x3d   : > { %1500 = dma.hbm_to_vmem [thread:$0]  (!%p1872_p11), %s2268_s3, 2048, %s1876_s6, [#allocation6], %s1783_s12, %s1783_s12, %s1784_s13  }
  0x3e   : > { %s1931_s16 = sadd.s32 1, %s1777_s21   ;;  %s29_s23 = sadd.s32 1, %s1773_s20 }
  0x3f   : > { %s26_s17 = ssub.s32 %s1777_s21, %s1931_s16  ;;  %p36_p6 = scmp.ne.s32.totalorder %s1773_s20, %s1769_s19 }
  0x40   : > { %p27_p13 = scmp.eq.s32.totalorder %s26_s17, 0  ;;  %p37_p10 = scmp.eq.s32.totalorder %s1777_s21, 0 }
  0x41   : > { %p2278_p5 = scmp.eq.s32.totalorder %s1842_s22, 1  ;;  %p1511_p9 = scmp.lt.s32.totalorder %s1777_s21, 2 }
  0x42   : > { %s1940_s27 = scalar_select %p27_p13, %s1773_s20, %s29_s23  }
  0x43   : > { %p38_p3 = por %p37_p10, %p36_p6  ;;  %p1944_p7 = por %p2278_p5, %p36_p6 }
  0x44   : > { %s208_s29 = sand.u32 1, %s1773_s20   ;;  %s1368_s6 = sshll.u32 %s1777_s21, 13 }
  0x45   : > { %s2279_s30 = scalar_select %p1944_p7, 1, 0 }
  0x46   : > { %s1304_s7 = sshll.u32 %s208_s29, 9  ;;  %s1954_s10 = scalar_lea.hbm %s2265_s0, %s1368_s6 }
  0x47   : > { %s212_s11 = scalar_lea.vmem [#allocation2], %s1304_s7  ;;  %p1958_p11 = pnand %p1511_p9, %p38_p3 }
  0x48   : > { %s220_s28 = sshll.u32 %s212_s11, 4  ;;  %s1962_s13 = scalar_lea.sflag [#allocation3], %s208_s29  ;;  %s1956_s28 = int_to_ptr.vmem [resolvable:$true] %s220_s28 }
  0x49   : > { %s1677_s14 = scalar_lea.hbm %s1954_s10, 8192  ;;  %p1679_p0 = pneg %p1958_p11 }
  0x4a   : > { %p1678_p12 = scmp.ne.s32.totalorder %s1954_s10, %s1677_s14  ;;  %s1682_s23 = scalar_lea.hbm %s2265_s0, 16384 }
  0x4b   : > { %p1683_p13 = scmp.lt.u32.totalorder %s1954_s10, %s2265_s0  ;;  %p1684_p6 = scmp.lt.u32.totalorder %s1682_s23, %s1677_s14 }
  0x4c   : > { %p1680_p2 = pnand %p1679_p0, %p1678_p12  ;;  %p1686_p3 = scmp.lt.u32.totalorder %s1677_s14, %s1954_s10 }
  0x4d   : > { %p1685_p10 = por %p1684_p6, %p1683_p13 }
  0x4e   : > { %p1681_p1 = pneg %p1680_p2 }
  0x4f   : > { %p1687_p5 = por %p1686_p3, %p1685_p10 }
  0x51   : > { %p1688_p9 = pnand %p1687_p5, %p1681_p1 }
  0x53   : > { %1691 = shalt.err (!%p1688_p9)
}
  0x54   : > { %s1692_s29 = scalar_lea.vmem %s1956_s28, 8192  ;;  %s1785_s8 = smov [#allocation2]  }
  0x55   : > { %p1693_p12 = scmp.ne.s32.totalorder %s1956_s28, %s1692_s29  ;;  %s1697_s9 = sshll.u32 %s1785_s8, 4  ;;  %s1698_s9 = int_to_ptr.vmem [resolvable:$false] %s1697_s9 }
  0x56   : > { %s1699_s11 = scalar_lea.vmem %s1698_s9, 16384  ;;  %p1700_p4 = scmp.lt.s32.totalorder %s1956_s28, %s1698_s9 }
  0x57   : > { %p1695_p2 = pnand %p1693_p12, %p1679_p0  ;;  %p1701_p13 = scmp.lt.s32.totalorder %s1699_s11, %s1692_s29 }
  0x59   : > { %p1696_p7 = pneg %p1695_p2  ;;  %p1702_p6 = por %p1701_p13, %p1700_p4 }
  0x5b   : > { %p1703_p10 = pnand %p1702_p6, %p1696_p7 }
  0x5d   : > { %1706 = shalt.err (!%p1703_p10)
}
  0x5e   : > { %s1786_s14 = smov 256   ;;  %s1787_s15 = smov 16  }
  0x5f   : > { %1504 = dma.hbm_to_vmem [thread:$0]  (!%p1958_p11), %s1954_s10, 8192, %s1956_s28, %s1962_s13, %s1786_s14, %s1786_s14, %s1787_s15  }
  0x60   : > { %232 = sbr.rel (%p1861_p8) target bundleno = 748 (0x2ec), region = 40  ;;  %s1993_s17 = sand.u32 (!%p1861_p8), 1, %s1769_s19  }
  0x61   : > { %s1309_s23 = sshll.u32 (!%p1861_p8), %s1993_s17, 9  ;;  %s235_s7 = scalar_lea.sflag (!%p1861_p8), [#allocation3], %s1993_s17 }
  0x62   : > { %s1997_s6 = scalar_lea.vmem (!%p1861_p8), [#allocation2], %s1309_s23  ;;  %p2281_p4 = scmp.ne.s32.totalorder (!%p1861_p8), %s2274_s24, 0 }
  0x67   : > { %1752 = dma.done.wait (%p2281_p4), %s235_s7, 8192  }
  0x68   : > { %1754 = vsyncadd (%p2281_p4), %s235_s7, 4294959104  ;;  %p2282_p7 = scmp.eq.s32.totalorder %s1842_s22, 0 }
  0x6a   : > { %1756 = dma.done.wait (%p2282_p7), [#allocation6], 6144   ;;  %p2283_p8 = pmov %p2282_p7 }
  0x6b   : > { %v1557_v0 = vld [vmem:[#allocation5 + $0x4] ss:$8 sps:$4 sm:$0xff]   ;;  %v1559_v1 = vld [vmem:[#allocation5] ss:$8 sps:$4 sm:$0xff]   ;;  %v1560_v2 = vld [vmem:[#allocation5 + $0x14] ss:$8 sps:$4 sm:$0xff]  }
  0x6c   : > { %1758 = vsyncadd (%p2283_p8), [#allocation6], 4294961152  ;;  %576 = vmatprep.subr.bf16.mxu0 %v1557_v0  ;;  %v1562_v3 = vld [vmem:[#allocation5 + $0x10] ss:$8 sps:$4 sm:$0xff]   ;;  %v1563_v4 = vld [vmem:[#allocation5 + $0x24] ss:$8 sps:$4 sm:$0xff]  }
  0x6d   : > { %577 = vmatpush1.bf16.msra.mxu0 %v1559_v1  ;;  %v1565_v5 = vld [vmem:[#allocation5 + $0x20] ss:$8 sps:$4 sm:$0xff]   ;;  %v1566_v6 = vld [vmem:[#allocation5 + $0x34] ss:$8 sps:$4 sm:$0xff]   ;;  %v1568_v7 = vld [vmem:[#allocation5 + $0x30] ss:$8 sps:$4 sm:$0xff]  }
  0x6e   : > { %578 = vmatprep.subr.bf16.mxu0 %v1560_v2  ;;  %v1569_v8 = vld [vmem:[#allocation5 + $0x44] ss:$8 sps:$4 sm:$0xff]   ;;  %v1571_v9 = vld [vmem:[#allocation5 + $0x40] ss:$8 sps:$4 sm:$0xff]   ;;  %v1572_v10 = vld [vmem:[#allocation5 + $0x54] ss:$8 sps:$4 sm:$0xff]  }
  0x6f   : > { %v1574_v11 = vld [vmem:[#allocation5 + $0x50] ss:$8 sps:$4 sm:$0xff]   ;;  %v1575_v12 = vld [vmem:[#allocation5 + $0x64] ss:$8 sps:$4 sm:$0xff]   ;;  %v1577_v16 = vld [vmem:[#allocation5 + $0x60] ss:$8 sps:$4 sm:$0xff]  }
  0x70   : > { %v277_v13 = vld [vmem:[%s1997_s6 + $0x8] sm:$0xff]  ;;  %v279_v14 = vld [vmem:[%s1997_s6 + $0x18] sm:$0xff]  ;;  %v1605_v34 = vld [vmem:[#allocation7 + $0x40] sm:$0xff]   ;;  %s1312_s10 = sshll.u32 %s1993_s17, 8  ;;  %s1369_s29 = sshll.u32 %s1842_s22, 12 }
  0x71   : > { %579 = vmatpush1.bf16.msra.mxu0 %v1562_v3  ;;  %v341_v15 = vpack.c.bf16 %v279_v14, %v277_v13  ;;  %v1578_v17 = vld [vmem:[#allocation5 + $0x74] ss:$8 sps:$4 sm:$0xff]   ;;  %v1580_v18 = vld [vmem:[#allocation5 + $0x70] ss:$8 sps:$4 sm:$0xff]   ;;  %v1581_v19 = vld [vmem:[#allocation5 + $0x84] ss:$8 sps:$4 sm:$0xff]   ;;  %1370 = vmatprep.subr.bf16.mxu1 %v1605_v34  ;;  %s2216_s14 = scalar_lea.hbm %s2270_s5, %s1369_s29 }
  0x72   : > { %580 = vmatprep.subr.bf16.mxu0 %v1563_v4  ;;  %v1583_v20 = vld [vmem:[#allocation5 + $0x80] ss:$8 sps:$4 sm:$0xff]   ;;  %v1584_v21 = vld [vmem:[#allocation5 + $0x94] ss:$8 sps:$4 sm:$0xff]   ;;  %v1586_v22 = vld [vmem:[#allocation5 + $0x90] ss:$8 sps:$4 sm:$0xff]  }
  0x73   : > { %608 = vmatprep.mubr.bf16.mxu0 %v341_v15  ;;  %v1587_v23 = vld [vmem:[#allocation5 + $0xa4] ss:$8 sps:$4 sm:$0xff]   ;;  %v1589_v24 = vld [vmem:[#allocation5 + $0xa0] ss:$8 sps:$4 sm:$0xff]   ;;  %v1590_v25 = vld [vmem:[#allocation5 + $0xb4] ss:$8 sps:$4 sm:$0xff]  }
  0x74   : > { %v1592_v26 = vld [vmem:[#allocation5 + $0xb0] ss:$8 sps:$4 sm:$0xff]   ;;  %v1593_v27 = vld [vmem:[#allocation5 + $0xc4] ss:$8 sps:$4 sm:$0xff]   ;;  %v1595_v28 = vld [vmem:[#allocation5 + $0xc0] ss:$8 sps:$4 sm:$0xff]  }
  0x75   : > { %581 = vmatpush1.bf16.msra.mxu0 %v1565_v5  ;;  %v1596_v29 = vld [vmem:[#allocation5 + $0xd4] ss:$8 sps:$4 sm:$0xff]   ;;  %v1598_v30 = vld [vmem:[#allocation5 + $0xd0] ss:$8 sps:$4 sm:$0xff]   ;;  %v1599_v31 = vld [vmem:[#allocation5 + $0xe4] ss:$8 sps:$4 sm:$0xff]  }
  0x76   : > { %582 = vmatprep.subr.bf16.mxu0 %v1566_v6  ;;  %v1601_v32 = vld [vmem:[#allocation5 + $0xe0] ss:$8 sps:$4 sm:$0xff]   ;;  %v1602_v33 = vld [vmem:[#allocation5 + $0xf4] ss:$8 sps:$4 sm:$0xff]   ;;  %v1604_v37 = vld [vmem:[#allocation5 + $0xf0] ss:$8 sps:$4 sm:$0xff]  }
  0x77   : > { %v1606_v35 = vld [vmem:[#allocation7] sm:$0xff]   ;;  %v1607_v36 = vld [vmem:[#allocation7 + $0x48] sm:$0xff]   ;;  %v278_v39 = vld [vmem:[%s1997_s6 + $0x10] sm:$0xff]  ;;  %s2149_s13 = scalar_lea.vmem [#allocation8], %s1312_s10  ;;  %s1194_s22 = scalar_lea.sflag [#allocation4], %s1993_s17 }
  0x78   : > { %v276_v38 = vld [vmem:[%s1997_s6] sm:$0xff]  ;;  %v281_v40 = vld [vmem:[%s1997_s6 + $0x28] sm:$0xff]  ;;  %v283_v41 = vld [vmem:[%s1997_s6 + $0x38] sm:$0xff]  ;;  %1371 = vmatpush3.bf16.msra.mxu1 %v1606_v35  ;;  %s1207_s8 = sshll.u32 %s2149_s13, 4  ;;  %p2284_p0 = scmp.ne.s32.totalorder %s2279_s30, 0  ;;  %s2218_s8 = int_to_ptr.vmem [resolvable:$true] %s1207_s8 }
  0x79   : > { %583 = vmatpush1.bf16.msra.mxu0 %v1568_v7  ;;  %v1608_v42 = vld [vmem:[#allocation7 + $0x8] sm:$0xff]   ;;  %v340_v43 = vpack.c.bf16 %v278_v39, %v276_v38  ;;  %1372 = vmatprep.subr.bf16.mxu1 %v1607_v36  ;;  %v1609_v44 = vld [vmem:[#allocation7 + $0x50] sm:$0xff]   ;;  %v343_v45 = vpack.c.bf16 %v283_v41, %v281_v40  ;;  %v1611_v47 = vld [vmem:[#allocation7 + $0x58] sm:$0xff]   ;;  %s1707_s15 = scalar_lea.vmem %s2218_s8, 4096  ;;  %s1788_s23 = smov [#allocation8]  }
  0x7a   : > { %584 = vmatprep.subr.bf16.mxu0 %v1569_v8  ;;  %v1610_v46 = vld [vmem:[#allocation7 + $0x10] sm:$0xff]   ;;  %v280_v48 = vld [vmem:[%s1997_s6 + $0x20] sm:$0xff]  ;;  %v285_v50 = vld [vmem:[%s1997_s6 + $0x48] sm:$0xff]  ;;  %p1708_p11 = scmp.ne.s32.totalorder %s2218_s8, %s1707_s15  ;;  %s1711_s7 = sshll.u32 %s1788_s23, 4  ;;  %s1712_s7 = int_to_ptr.vmem [resolvable:$false] %s1711_s7 }
  0x7b   : > { %v282_v49 = vld [vmem:[%s1997_s6 + $0x30] sm:$0xff]  ;;  %v287_v51 = vld [vmem:[%s1997_s6 + $0x58] sm:$0xff]  ;;  %v1613_v54 = vld [vmem:[#allocation7 + $0x60] sm:$0xff]   ;;  %p1714_p5 = scmp.lt.s32.totalorder %s2218_s8, %s1712_s7 }
  0x7c   : > { %1373 = vmatpush3.bf16.msra.mxu1 %v1608_v42  ;;  %v1612_v52 = vld [vmem:[#allocation7 + $0x18] sm:$0xff]   ;;  %v342_v53 = vpack.c.bf16 %v282_v49, %v280_v48  ;;  %v345_v55 = vpack.c.bf16 %v287_v51, %v285_v50  ;;  %v1614_v56 = vld [vmem:[#allocation7 + $0x20] sm:$0xff]   ;;  %v1615_v57 = vld [vmem:[#allocation7 + $0x68] sm:$0xff]   ;;  %p1709_p1 = pnand %p1708_p11, %p2284_p0 }
  0x7d   : > { %585 = vmatpush1.bf16.msra.mxu0 %v1571_v9  ;;  %1374 = vmatprep.subr.bf16.mxu1 %v1609_v44  ;;  %v284_v58 = vld [vmem:[%s1997_s6 + $0x40] sm:$0xff]  ;;  %v286_v59 = vld [vmem:[%s1997_s6 + $0x50] sm:$0xff]  ;;  %v289_v60 = vld [vmem:[%s1997_s6 + $0x68] sm:$0xff] }
  0x7e   : > { %586 = vmatprep.subr.bf16.mxu0 %v1572_v10  ;;  %v291_v61 = vld [vmem:[%s1997_s6 + $0x78] sm:$0xff]  ;;  %v344_v62 = vpack.c.bf16 %v286_v59, %v284_v58  ;;  %v288_v0 = vld [vmem:[%s1997_s6 + $0x60] sm:$0xff]  ;;  %v290_v1 = vld [vmem:[%s1997_s6 + $0x70] sm:$0xff]  ;;  %p1710_p3 = pneg %p1709_p1 }
  0x7f   : > { %v347_v63 = vpack.c.bf16 %v291_v61, %v289_v60  ;;  %v293_v2 = vld [vmem:[%s1997_s6 + $0x88] sm:$0xff]  ;;  %v295_v3 = vld [vmem:[%s1997_s6 + $0x98] sm:$0xff]  ;;  %v346_v4 = vpack.c.bf16 %v290_v1, %v288_v0  ;;  %v292_v6 = vld [vmem:[%s1997_s6 + $0x80] sm:$0xff] }
  0x80   : > { %1375 = vmatpush3.bf16.msra.mxu1 %v1610_v46  ;;  %v349_v5 = vpack.c.bf16 %v295_v3, %v293_v2  ;;  %v294_v7 = vld [vmem:[%s1997_s6 + $0x90] sm:$0xff]  ;;  %v297_v8 = vld [vmem:[%s1997_s6 + $0xa8] sm:$0xff]  ;;  %v299_v9 = vld [vmem:[%s1997_s6 + $0xb8] sm:$0xff] }
  0x81   : > { %587 = vmatpush1.bf16.msra.mxu0 %v1574_v11  ;;  %1376 = vmatprep.subr.bf16.mxu1 %v1611_v47  ;;  %v348_v10 = vpack.c.bf16 %v294_v7, %v292_v6  ;;  %v351_v11 = vpack.c.bf16 %v299_v9, %v297_v8  ;;  %v298_v13 = vld [vmem:[%s1997_s6 + $0xb0] sm:$0xff]  ;;  %v301_v14 = vld [vmem:[%s1997_s6 + $0xc8] sm:$0xff]  ;;  %v303_v15 = vld [vmem:[%s1997_s6 + $0xd8] sm:$0xff] }
  0x82   : > { %588 = vmatprep.subr.bf16.mxu0 %v1575_v12  ;;  %v296_v12 = vld [vmem:[%s1997_s6 + $0xa0] sm:$0xff]  ;;  %v317_v38 = vld [vmem:[%s1997_s6 + $0x148] sm:$0xff]  ;;  %v319_v39 = vld [vmem:[%s1997_s6 + $0x158] sm:$0xff] }
  0x83   : > { %v312_v36 = vld [vmem:[%s1997_s6 + $0x120] sm:$0xff]  ;;  %v361_v41 = vpack.c.bf16 %v319_v39, %v317_v38  ;;  %v321_v44 = vld [vmem:[%s1997_s6 + $0x168] sm:$0xff]  ;;  %v322_v49 = vld [vmem:[%s1997_s6 + $0x170] sm:$0xff] }
  0x84   : > { %1377 = vmatpush3.bf16.msra.mxu1 %v1612_v52  ;;  %v316_v42 = vld [vmem:[%s1997_s6 + $0x140] sm:$0xff]  ;;  %v1616_v50 = vld [vmem:[#allocation7 + $0x28] sm:$0xff]   ;;  %v327_v52 = vld [vmem:[%s1997_s6 + $0x198] sm:$0xff] }
  0x85   : > { %589 = vmatpush1.bf16.msra.mxu0 %v1577_v16  ;;  %1378 = vmatprep.subr.bf16.mxu1 %v1613_v54  ;;  %v350_v16 = vpack.c.bf16 %v298_v13, %v296_v12  ;;  %v320_v48 = vld [vmem:[%s1997_s6 + $0x160] sm:$0xff]  ;;  %v325_v51 = vld [vmem:[%s1997_s6 + $0x188] sm:$0xff]  ;;  %v1617_v54 = vld [vmem:[#allocation7 + $0x70] sm:$0xff]  }
  0x86   : > { %590 = vmatprep.subr.bf16.mxu0 %v1578_v17  ;;  %v353_v17 = vpack.c.bf16 %v303_v15, %v301_v14  ;;  %v324_v58 = vld [vmem:[%s1997_s6 + $0x180] sm:$0xff]  ;;  %v326_v59 = vld [vmem:[%s1997_s6 + $0x190] sm:$0xff]  ;;  %v1620_v60 = vld [vmem:[#allocation7 + $0x38] sm:$0xff]  }
  0x87   : > { %v329_v61 = vld [vmem:[%s1997_s6 + $0x1a8] sm:$0xff]  ;;  %v328_v1 = vld [vmem:[%s1997_s6 + $0x1a0] sm:$0xff]  ;;  %v330_v2 = vld [vmem:[%s1997_s6 + $0x1b0] sm:$0xff] }
  0x88   : > { %1379 = vmatpush3.bf16.msra.mxu1 %v1614_v56  ;;  %v1618_v56 = vld [vmem:[#allocation7 + $0x30] sm:$0xff]   ;;  %v333_v3 = vld [vmem:[%s1997_s6 + $0x1c8] sm:$0xff]  ;;  %v332_v7 = vld [vmem:[%s1997_s6 + $0x1c0] sm:$0xff] }
  0x89   : > { %591 = vmatpush1.bf16.msra.mxu0 %v1580_v18  ;;  %1380 = vmatprep.subr.bf16.mxu1 %v1615_v57  ;;  %v300_v18 = vld [vmem:[%s1997_s6 + $0xc0] sm:$0xff]  ;;  %v1619_v57 = vld [vmem:[#allocation7 + $0x78] sm:$0xff]   ;;  %v334_v8 = vld [vmem:[%s1997_s6 + $0x1d0] sm:$0xff] }
  0x8a   : > { %592 = vmatprep.subr.bf16.mxu0 %v1581_v19  ;;  %v302_v19 = vld [vmem:[%s1997_s6 + $0xd0] sm:$0xff]  ;;  %v337_v9 = vld [vmem:[%s1997_s6 + $0x1e8] sm:$0xff]  ;;  %v336_v13 = vld [vmem:[%s1997_s6 + $0x1e0] sm:$0xff] }
  0x8b   : > { %v338_v14 = vld [vmem:[%s1997_s6 + $0x1f0] sm:$0xff] }
  0x8c   : > { %1381 = vmatpush3.bf16.msra.mxu1 %v1616_v50  ;;  %v370_v15 = vpack.c.bf16 %v338_v14, %v336_v13 }
  0x8d   : > { %593 = vmatpush1.bf16.msra.mxu0 %v1583_v20  ;;  %v305_v20 = vld [vmem:[%s1997_s6 + $0xe8] sm:$0xff]  ;;  %1382 = vmatprep.subr.bf16.mxu1 %v1617_v54 }
  0x8e   : > { %594 = vmatprep.subr.bf16.mxu0 %v1584_v21  ;;  %v307_v21 = vld [vmem:[%s1997_s6 + $0xf8] sm:$0xff] }
  0x90   : > { %1383 = vmatpush3.bf16.msra.mxu1 %v1618_v56 }
  0x91   : > { %595 = vmatpush1.bf16.msra.mxu0 %v1586_v22  ;;  %v352_v22 = vpack.c.bf16 %v302_v19, %v300_v18  ;;  %1384 = vmatprep.subr.bf16.mxu1 %v1619_v57  ;;  %v404_v19 = vld [vmem:[%s2267_s2] sm:$0x3] }
  0x92   : > { %596 = vmatprep.subr.bf16.mxu0 %v1587_v23  ;;  %v355_v23 = vpack.c.bf16 %v307_v21, %v305_v20 }
  0x94   : > { %1385 = vmatpush3.bf16.msra.mxu1 %v1620_v60 }
  0x95   : > { %597 = vmatpush1.bf16.msra.mxu0 %v1589_v24  ;;  %v304_v24 = vld [vmem:[%s1997_s6 + $0xe0] sm:$0xff] }
  0x96   : > { %598 = vmatprep.subr.bf16.mxu0 %v1590_v25  ;;  %v306_v25 = vld [vmem:[%s1997_s6 + $0xf0] sm:$0xff] }
  0x99   : > { %599 = vmatpush1.bf16.msra.mxu0 %v1592_v26  ;;  %v309_v26 = vld [vmem:[%s1997_s6 + $0x108] sm:$0xff] }
  0x9a   : > { %600 = vmatprep.subr.bf16.mxu0 %v1593_v27  ;;  %v311_v27 = vld [vmem:[%s1997_s6 + $0x118] sm:$0xff] }
  0x9d   : > { %601 = vmatpush1.bf16.msra.mxu0 %v1595_v28  ;;  %v354_v28 = vpack.c.bf16 %v306_v25, %v304_v24 }
  0x9e   : > { %602 = vmatprep.subr.bf16.mxu0 %v1596_v29  ;;  %v357_v29 = vpack.c.bf16 %v311_v27, %v309_v26 }
  0xa1   : > { %603 = vmatpush1.bf16.msra.mxu0 %v1598_v30  ;;  %v308_v30 = vld [vmem:[%s1997_s6 + $0x100] sm:$0xff] }
  0xa2   : > { %604 = vmatprep.subr.bf16.mxu0 %v1599_v31  ;;  %v310_v31 = vld [vmem:[%s1997_s6 + $0x110] sm:$0xff] }
  0xa3   : > { %v356_v34 = vpack.c.bf16 %v310_v31, %v308_v30 }
  0xa5   : > { %605 = vmatpush1.bf16.msra.mxu0 %v1601_v32  ;;  %v313_v32 = vld [vmem:[%s1997_s6 + $0x128] sm:$0xff] }
  0xa6   : > { %606 = vmatprep.subr.bf16.mxu0 %v1602_v33  ;;  %v315_v33 = vld [vmem:[%s1997_s6 + $0x138] sm:$0xff] }
  0xa7   : > { %v359_v35 = vpack.c.bf16 %v315_v33, %v313_v32 }
  0xa9   : > { %607 = vmatpush1.bf16.msra.mxu0 %v1604_v37  ;;  %v314_v37 = vld [vmem:[%s1997_s6 + $0x130] sm:$0xff] }
  0xaa   : > { %v358_v40 = vpack.c.bf16 %v314_v37, %v312_v36 }
  0xac   : > { %609 = vmatmul.mubr.bf16.vlgmr.msra.gmra.mrb[0].mxu0 %v340_v43  ;;  %v318_v43 = vld [vmem:[%s1997_s6 + $0x150] sm:$0xff] }
  0xad   : > { %618 = vmatprep.mubr.bf16.mxu0 %v343_v45  ;;  %v323_v45 = vld [vmem:[%s1997_s6 + $0x178] sm:$0xff]  ;;  %v360_v46 = vpack.c.bf16 %v318_v43, %v316_v42 }
  0xae   : > { %v363_v47 = vpack.c.bf16 %v323_v45, %v321_v44 }
  0xb4   : > { %619 = vmatmul.mubr.bf16.gmra.mrb[4].mxu0 %v342_v53  ;;  %v362_v53 = vpack.c.bf16 %v322_v49, %v320_v48 }
  0xb5   : > { %628 = vmatprep.mubr.bf16.mxu0 %v345_v55  ;;  %v365_v55 = vpack.c.bf16 %v327_v52, %v325_v51 }
  0xbc   : > { %629 = vmatmul.mubr.bf16.gmra.mrb[8].mxu0 %v344_v62  ;;  %v331_v62 = vld [vmem:[%s1997_s6 + $0x1b8] sm:$0xff] }
  0xbd   : > { %638 = vmatprep.mubr.bf16.mxu0 %v347_v63  ;;  %v364_v63 = vpack.c.bf16 %v326_v59, %v324_v58  ;;  %v367_v0 = vpack.c.bf16 %v331_v62, %v329_v61 }
  0xc4   : > { %639 = vmatmul.mubr.bf16.gmra.mrb[12].mxu0 %v346_v4  ;;  %v335_v4 = vld [vmem:[%s1997_s6 + $0x1d8] sm:$0xff] }
  0xc5   : > { %648 = vmatprep.mubr.bf16.mxu0 %v349_v5  ;;  %v366_v5 = vpack.c.bf16 %v330_v2, %v328_v1  ;;  %v369_v6 = vpack.c.bf16 %v335_v4, %v333_v3 }
  0xcc   : > { %649 = vmatmul.mubr.bf16.gmra.mrb[16].mxu0 %v348_v10  ;;  %v339_v10 = vld [vmem:[%s1997_s6 + $0x1f8] sm:$0xff]  ;;  %s1713_s6 = scalar_lea.vmem %s1712_s7, 8192 }
  0xcd   : > { %658 = vmatprep.mubr.bf16.mxu0 %v351_v11  ;;  %v368_v11 = vpack.c.bf16 %v334_v8, %v332_v7  ;;  %v371_v12 = vpack.c.bf16 %v339_v10, %v337_v9  ;;  %p1715_p9 = scmp.lt.s32.totalorder %s1713_s6, %s1707_s15 }
  0xcf   : > { %p1716_p12 = por %p1715_p9, %p1714_p5 }
  0xd1   : > { %p1717_p2 = pnand %p1716_p12, %p1710_p3 }
  0xd4   : > { %659 = vmatmul.mubr.bf16.gmra.mrb[20].mxu0 %v350_v16  ;;  %v406_v16 = vlaneseq }
  0xd5   : > { %668 = vmatprep.mubr.bf16.mxu0 %v353_v17 }
  0xd6   : > { %v407_v17 = vshrl.u32 %v406_v16, 7 }
  0xd8   : > { %v408_v18 = vsub.s32 0, %v407_v17  ;;  %v412_v20 = vsub.s32 1, %v407_v17 }
  0xda   : > { %v2074_v21 = vrot.slane %v404_v19, %v408_v18 }
  0xdc   : > { %669 = vmatmul.mubr.bf16.gmra.mrb[24].mxu0 %v352_v22  ;;  %v2076_v22 = vrot.slane %v404_v19, %v412_v20 }
  0xdd   : > { %678 = vmatprep.mubr.bf16.mxu0 %v355_v23 }
  0xe4   : > { %679 = vmatmul.mubr.bf16.gmra.mrb[28].mxu0 %v354_v28 }
  0xe5   : > { %688 = vmatprep.mubr.bf16.mxu0 %v357_v29 }
  0xec   : > { %689 = vmatmul.mubr.bf16.gmra.mrb[32].mxu0 %v356_v34 }
  0xed   : > { %698 = vmatprep.mubr.bf16.mxu0 %v359_v35 }
  0xf4   : > { %699 = vmatmul.mubr.bf16.gmra.mrb[36].mxu0 %v358_v40 }
  0xf5   : > { %708 = vmatprep.mubr.bf16.mxu0 %v361_v41 }
  0xfc   : > { %709 = vmatmul.mubr.bf16.gmra.mrb[40].mxu0 %v360_v46 }
  0xfd   : > { %718 = vmatprep.mubr.bf16.mxu0 %v363_v47 }
 0x104   : > { %719 = vmatmul.mubr.bf16.gmra.mrb[44].mxu0 %v362_v53 }
 0x105   : > { %728 = vmatprep.mubr.bf16.mxu0 %v365_v55 }
 0x10c   : > { %729 = vmatmul.mubr.bf16.gmra.mrb[48].mxu0 %v364_v63 }
 0x10d   : > { %738 = vmatprep.mubr.bf16.mxu0 %v367_v0 }
 0x114   : > { %739 = vmatmul.mubr.bf16.gmra.mrb[52].mxu0 %v366_v5 }
 0x115   : > { %748 = vmatprep.mubr.bf16.mxu0 %v369_v6 }
 0x11c   : > { %749 = vmatmul.mubr.bf16.gmra.mrb[56].mxu0 %v368_v11 }
 0x11d   : > { %758 = vmatprep.mubr.bf16.mxu0 %v371_v12 }
 0x124   : > { %759 = vmatmul.mubr.bf16.gmra.mrb[60].mxu0 %v370_v15 }
 0x17f   : > { %v610_v23 = vpop.f32.mrb[0].mxu0 }
 0x180   : > { %v611_v24 = vadd.f32 %v610_v23, %v2074_v21  ;;  %v612_v25 = vpop.f32.mrb[1].mxu0 }
 0x181   : > { %v613_v26 = vadd.f32 %v612_v25, %v2076_v22  ;;  %v614_v27 = vpop.f32.mrb[2].mxu0 }
 0x182   : > { %v615_v28 = vadd.f32 %v614_v27, %v2074_v21  ;;  %v616_v29 = vpop.f32.mrb[3].mxu0  ;;  %v769_v31 = vmax.f32 %v611_v24, 0.0 }
 0x183   : > { %v617_v30 = vadd.f32 %v616_v29, %v2076_v22  ;;  %v770_v33 = vmax.f32 %v613_v26, 0.0 }
 0x184   : > { %v771_v32 = vmax.f32 %v615_v28, 0.0 }
 0x185   : > { %v772_v34 = vmax.f32 %v617_v30, 0.0 }
 0x186   : > { %v833_v35 = vpack.c.bf16 %v771_v32, %v769_v31 }
 0x187   : > { %v620_v36 = vpop.f32.mrb[4].mxu0  ;;  %v834_v37 = vpack.c.bf16 %v772_v34, %v770_v33 }
 0x188   : > { %v621_v38 = vadd.f32 %v620_v36, %v2074_v21  ;;  %v622_v39 = vpop.f32.mrb[5].mxu0 }
 0x189   : > { %v623_v40 = vadd.f32 %v622_v39, %v2076_v22  ;;  %v624_v41 = vpop.f32.mrb[6].mxu0  ;;  %1032 = vmatprep.mubr.bf16.mxu1 %v834_v37 }
 0x18a   : > { %v625_v42 = vadd.f32 %v624_v41, %v2074_v21  ;;  %v626_v43 = vpop.f32.mrb[7].mxu0  ;;  %1033 = vmatmul.mubr.bf16.vlgmr.msra.gmra.mrb[0].mxu1 %v833_v35  ;;  %v773_v45 = vmax.f32 %v621_v38, 0.0 }
 0x18b   : > { %v627_v44 = vadd.f32 %v626_v43, %v2076_v22  ;;  %v774_v47 = vmax.f32 %v623_v40, 0.0 }
 0x18c   : > { %v775_v46 = vmax.f32 %v625_v42, 0.0 }
 0x18d   : > { %v776_v48 = vmax.f32 %v627_v44, 0.0 }
 0x18e   : > { %v835_v49 = vpack.c.bf16 %v775_v46, %v773_v45 }
 0x18f   : > { %v836_v50 = vpack.c.bf16 %v776_v48, %v774_v47  ;;  %v630_v51 = vpop.f32.mrb[8].mxu0 }
 0x190   : > { %v631_v52 = vadd.f32 %v630_v51, %v2074_v21  ;;  %v632_v53 = vpop.f32.mrb[9].mxu0 }
 0x191   : > { %v633_v54 = vadd.f32 %v632_v53, %v2076_v22  ;;  %v634_v55 = vpop.f32.mrb[10].mxu0  ;;  %1040 = vmatprep.mubr.bf16.mxu1 %v836_v50 }
 0x192   : > { %v635_v56 = vadd.f32 %v634_v55, %v2074_v21  ;;  %v636_v57 = vpop.f32.mrb[11].mxu0  ;;  %1041 = vmatmul.mubr.bf16.gmra.mrb[4].mxu1 %v835_v49  ;;  %v777_v59 = vmax.f32 %v631_v52, 0.0 }
 0x193   : > { %v637_v58 = vadd.f32 %v636_v57, %v2076_v22  ;;  %v778_v61 = vmax.f32 %v633_v54, 0.0 }
 0x194   : > { %v779_v60 = vmax.f32 %v635_v56, 0.0 }
 0x195   : > { %v780_v62 = vmax.f32 %v637_v58, 0.0 }
 0x196   : > { %v837_v63 = vpack.c.bf16 %v779_v60, %v777_v59 }
 0x197   : > { %v838_v0 = vpack.c.bf16 %v780_v62, %v778_v61  ;;  %v640_v1 = vpop.f32.mrb[12].mxu0 }
 0x198   : > { %v641_v2 = vadd.f32 %v640_v1, %v2074_v21  ;;  %v642_v3 = vpop.f32.mrb[13].mxu0 }
 0x199   : > { %v643_v4 = vadd.f32 %v642_v3, %v2076_v22  ;;  %v644_v5 = vpop.f32.mrb[14].mxu0  ;;  %1048 = vmatprep.mubr.bf16.mxu1 %v838_v0 }
 0x19a   : > { %v645_v6 = vadd.f32 %v644_v5, %v2074_v21  ;;  %v646_v7 = vpop.f32.mrb[15].mxu0  ;;  %1049 = vmatmul.mubr.bf16.gmra.mrb[8].mxu1 %v837_v63  ;;  %v781_v9 = vmax.f32 %v641_v2, 0.0 }
 0x19b   : > { %v647_v8 = vadd.f32 %v646_v7, %v2076_v22  ;;  %v782_v11 = vmax.f32 %v643_v4, 0.0 }
 0x19c   : > { %v783_v10 = vmax.f32 %v645_v6, 0.0 }
 0x19d   : > { %v784_v12 = vmax.f32 %v647_v8, 0.0 }
 0x19e   : > { %v839_v13 = vpack.c.bf16 %v783_v10, %v781_v9 }
 0x19f   : > { %v840_v14 = vpack.c.bf16 %v784_v12, %v782_v11  ;;  %v650_v15 = vpop.f32.mrb[16].mxu0 }
 0x1a0   : > { %v651_v16 = vadd.f32 %v650_v15, %v2074_v21  ;;  %v652_v17 = vpop.f32.mrb[17].mxu0 }
 0x1a1   : > { %v653_v18 = vadd.f32 %v652_v17, %v2076_v22  ;;  %v654_v19 = vpop.f32.mrb[18].mxu0  ;;  %1056 = vmatprep.mubr.bf16.mxu1 %v840_v14 }
 0x1a2   : > { %v655_v20 = vadd.f32 %v654_v19, %v2074_v21  ;;  %v656_v23 = vpop.f32.mrb[19].mxu0  ;;  %1057 = vmatmul.mubr.bf16.gmra.mrb[12].mxu1 %v839_v13  ;;  %v785_v25 = vmax.f32 %v651_v16, 0.0 }
 0x1a3   : > { %v657_v24 = vadd.f32 %v656_v23, %v2076_v22  ;;  %v786_v27 = vmax.f32 %v653_v18, 0.0 }
 0x1a4   : > { %v787_v26 = vmax.f32 %v655_v20, 0.0 }
 0x1a5   : > { %v788_v28 = vmax.f32 %v657_v24, 0.0 }
 0x1a6   : > { %v841_v29 = vpack.c.bf16 %v787_v26, %v785_v25 }
 0x1a7   : > { %v842_v30 = vpack.c.bf16 %v788_v28, %v786_v27  ;;  %v660_v31 = vpop.f32.mrb[20].mxu0 }
 0x1a8   : > { %v661_v32 = vadd.f32 %v660_v31, %v2074_v21  ;;  %v662_v33 = vpop.f32.mrb[21].mxu0 }
 0x1a9   : > { %v663_v34 = vadd.f32 %v662_v33, %v2076_v22  ;;  %v664_v35 = vpop.f32.mrb[22].mxu0  ;;  %1064 = vmatprep.mubr.bf16.mxu1 %v842_v30 }
 0x1aa   : > { %v665_v36 = vadd.f32 %v664_v35, %v2074_v21  ;;  %v666_v37 = vpop.f32.mrb[23].mxu0  ;;  %1065 = vmatmul.mubr.bf16.gmra.mrb[16].mxu1 %v841_v29  ;;  %v789_v39 = vmax.f32 %v661_v32, 0.0 }
 0x1ab   : > { %v667_v38 = vadd.f32 %v666_v37, %v2076_v22  ;;  %v790_v41 = vmax.f32 %v663_v34, 0.0 }
 0x1ac   : > { %v791_v40 = vmax.f32 %v665_v36, 0.0 }
 0x1ad   : > { %v792_v42 = vmax.f32 %v667_v38, 0.0 }
 0x1ae   : > { %v843_v43 = vpack.c.bf16 %v791_v40, %v789_v39 }
 0x1af   : > { %v844_v44 = vpack.c.bf16 %v792_v42, %v790_v41  ;;  %v670_v45 = vpop.f32.mrb[24].mxu0 }
 0x1b0   : > { %v671_v46 = vadd.f32 %v670_v45, %v2074_v21  ;;  %v672_v47 = vpop.f32.mrb[25].mxu0 }
 0x1b1   : > { %v673_v48 = vadd.f32 %v672_v47, %v2076_v22  ;;  %v674_v49 = vpop.f32.mrb[26].mxu0  ;;  %1072 = vmatprep.mubr.bf16.mxu1 %v844_v44 }
 0x1b2   : > { %v675_v50 = vadd.f32 %v674_v49, %v2074_v21  ;;  %v676_v51 = vpop.f32.mrb[27].mxu0  ;;  %1073 = vmatmul.mubr.bf16.gmra.mrb[20].mxu1 %v843_v43  ;;  %v793_v53 = vmax.f32 %v671_v46, 0.0 }
 0x1b3   : > { %v677_v52 = vadd.f32 %v676_v51, %v2076_v22  ;;  %v794_v55 = vmax.f32 %v673_v48, 0.0 }
 0x1b4   : > { %v795_v54 = vmax.f32 %v675_v50, 0.0 }
 0x1b5   : > { %v796_v56 = vmax.f32 %v677_v52, 0.0 }
 0x1b6   : > { %v845_v57 = vpack.c.bf16 %v795_v54, %v793_v53 }
 0x1b7   : > { %v846_v58 = vpack.c.bf16 %v796_v56, %v794_v55  ;;  %v680_v59 = vpop.f32.mrb[28].mxu0 }
 0x1b8   : > { %v681_v60 = vadd.f32 %v680_v59, %v2074_v21  ;;  %v682_v61 = vpop.f32.mrb[29].mxu0 }
 0x1b9   : > { %v683_v62 = vadd.f32 %v682_v61, %v2076_v22  ;;  %v684_v63 = vpop.f32.mrb[30].mxu0  ;;  %1080 = vmatprep.mubr.bf16.mxu1 %v846_v58 }
 0x1ba   : > { %v685_v0 = vadd.f32 %v684_v63, %v2074_v21  ;;  %v686_v1 = vpop.f32.mrb[31].mxu0  ;;  %1081 = vmatmul.mubr.bf16.gmra.mrb[24].mxu1 %v845_v57  ;;  %v797_v3 = vmax.f32 %v681_v60, 0.0 }
 0x1bb   : > { %v687_v2 = vadd.f32 %v686_v1, %v2076_v22  ;;  %v798_v5 = vmax.f32 %v683_v62, 0.0 }
 0x1bc   : > { %v799_v4 = vmax.f32 %v685_v0, 0.0 }
 0x1bd   : > { %v800_v6 = vmax.f32 %v687_v2, 0.0 }
 0x1be   : > { %v847_v7 = vpack.c.bf16 %v799_v4, %v797_v3 }
 0x1bf   : > { %v848_v8 = vpack.c.bf16 %v800_v6, %v798_v5  ;;  %v690_v9 = vpop.f32.mrb[32].mxu0 }
 0x1c0   : > { %v691_v10 = vadd.f32 %v690_v9, %v2074_v21  ;;  %v692_v11 = vpop.f32.mrb[33].mxu0 }
 0x1c1   : > { %v693_v12 = vadd.f32 %v692_v11, %v2076_v22  ;;  %v694_v13 = vpop.f32.mrb[34].mxu0  ;;  %1088 = vmatprep.mubr.bf16.mxu1 %v848_v8 }
 0x1c2   : > { %v695_v14 = vadd.f32 %v694_v13, %v2074_v21  ;;  %v696_v15 = vpop.f32.mrb[35].mxu0  ;;  %1089 = vmatmul.mubr.bf16.gmra.mrb[28].mxu1 %v847_v7  ;;  %v801_v17 = vmax.f32 %v691_v10, 0.0 }
 0x1c3   : > { %v697_v16 = vadd.f32 %v696_v15, %v2076_v22  ;;  %v802_v19 = vmax.f32 %v693_v12, 0.0 }
 0x1c4   : > { %v803_v18 = vmax.f32 %v695_v14, 0.0 }
 0x1c5   : > { %v804_v20 = vmax.f32 %v697_v16, 0.0 }
 0x1c6   : > { %v849_v23 = vpack.c.bf16 %v803_v18, %v801_v17 }
 0x1c7   : > { %v850_v24 = vpack.c.bf16 %v804_v20, %v802_v19  ;;  %v700_v25 = vpop.f32.mrb[36].mxu0 }
 0x1c8   : > { %v701_v26 = vadd.f32 %v700_v25, %v2074_v21  ;;  %v702_v27 = vpop.f32.mrb[37].mxu0 }
 0x1c9   : > { %v703_v28 = vadd.f32 %v702_v27, %v2076_v22  ;;  %v704_v29 = vpop.f32.mrb[38].mxu0  ;;  %1096 = vmatprep.mubr.bf16.mxu1 %v850_v24 }
 0x1ca   : > { %v705_v30 = vadd.f32 %v704_v29, %v2074_v21  ;;  %v706_v31 = vpop.f32.mrb[39].mxu0  ;;  %1097 = vmatmul.mubr.bf16.gmra.mrb[32].mxu1 %v849_v23  ;;  %v805_v33 = vmax.f32 %v701_v26, 0.0 }
 0x1cb   : > { %v707_v32 = vadd.f32 %v706_v31, %v2076_v22  ;;  %v806_v35 = vmax.f32 %v703_v28, 0.0 }
 0x1cc   : > { %v807_v34 = vmax.f32 %v705_v30, 0.0 }
 0x1cd   : > { %v808_v36 = vmax.f32 %v707_v32, 0.0 }
 0x1ce   : > { %v851_v37 = vpack.c.bf16 %v807_v34, %v805_v33 }
 0x1cf   : > { %v852_v38 = vpack.c.bf16 %v808_v36, %v806_v35  ;;  %v710_v39 = vpop.f32.mrb[40].mxu0 }
 0x1d0   : > { %v711_v40 = vadd.f32 %v710_v39, %v2074_v21  ;;  %v712_v41 = vpop.f32.mrb[41].mxu0 }
 0x1d1   : > { %v713_v42 = vadd.f32 %v712_v41, %v2076_v22  ;;  %v714_v43 = vpop.f32.mrb[42].mxu0  ;;  %1104 = vmatprep.mubr.bf16.mxu1 %v852_v38 }
 0x1d2   : > { %v715_v44 = vadd.f32 %v714_v43, %v2074_v21  ;;  %v716_v45 = vpop.f32.mrb[43].mxu0  ;;  %1105 = vmatmul.mubr.bf16.gmra.mrb[36].mxu1 %v851_v37  ;;  %v809_v47 = vmax.f32 %v711_v40, 0.0 }
 0x1d3   : > { %v717_v46 = vadd.f32 %v716_v45, %v2076_v22  ;;  %v810_v49 = vmax.f32 %v713_v42, 0.0 }
 0x1d4   : > { %v811_v48 = vmax.f32 %v715_v44, 0.0 }
 0x1d5   : > { %v812_v50 = vmax.f32 %v717_v46, 0.0 }
 0x1d6   : > { %v853_v51 = vpack.c.bf16 %v811_v48, %v809_v47 }
 0x1d7   : > { %v854_v52 = vpack.c.bf16 %v812_v50, %v810_v49  ;;  %v720_v53 = vpop.f32.mrb[44].mxu0 }
 0x1d8   : > { %v721_v54 = vadd.f32 %v720_v53, %v2074_v21  ;;  %v722_v55 = vpop.f32.mrb[45].mxu0 }
 0x1d9   : > { %v723_v56 = vadd.f32 %v722_v55, %v2076_v22  ;;  %v724_v57 = vpop.f32.mrb[46].mxu0  ;;  %1112 = vmatprep.mubr.bf16.mxu1 %v854_v52 }
 0x1da   : > { %v725_v58 = vadd.f32 %v724_v57, %v2074_v21  ;;  %v726_v59 = vpop.f32.mrb[47].mxu0  ;;  %1113 = vmatmul.mubr.bf16.gmra.mrb[40].mxu1 %v853_v51  ;;  %v813_v61 = vmax.f32 %v721_v54, 0.0 }
 0x1db   : > { %v727_v60 = vadd.f32 %v726_v59, %v2076_v22  ;;  %v814_v63 = vmax.f32 %v723_v56, 0.0 }
 0x1dc   : > { %v815_v62 = vmax.f32 %v725_v58, 0.0 }
 0x1dd   : > { %v816_v0 = vmax.f32 %v727_v60, 0.0 }
 0x1de   : > { %v855_v1 = vpack.c.bf16 %v815_v62, %v813_v61  ;;  %v2146_v62 = vld [vmem:[%s2269_s4] ss:$0 sm:$0xff] }
 0x1df   : > { %v856_v2 = vpack.c.bf16 %v816_v0, %v814_v63  ;;  %v730_v3 = vpop.f32.mrb[48].mxu0 }
 0x1e0   : > { %v731_v4 = vadd.f32 %v730_v3, %v2074_v21  ;;  %v732_v5 = vpop.f32.mrb[49].mxu0 }
 0x1e1   : > { %v733_v6 = vadd.f32 %v732_v5, %v2076_v22  ;;  %v734_v7 = vpop.f32.mrb[50].mxu0  ;;  %1120 = vmatprep.mubr.bf16.mxu1 %v856_v2 }
 0x1e2   : > { %v735_v8 = vadd.f32 %v734_v7, %v2074_v21  ;;  %v736_v9 = vpop.f32.mrb[51].mxu0  ;;  %1121 = vmatmul.mubr.bf16.gmra.mrb[44].mxu1 %v855_v1  ;;  %v817_v11 = vmax.f32 %v731_v4, 0.0 }
 0x1e3   : > { %v737_v10 = vadd.f32 %v736_v9, %v2076_v22  ;;  %v818_v13 = vmax.f32 %v733_v6, 0.0 }
 0x1e4   : > { %v819_v12 = vmax.f32 %v735_v8, 0.0 }
 0x1e5   : > { %v820_v14 = vmax.f32 %v737_v10, 0.0 }
 0x1e6   : > { %v857_v15 = vpack.c.bf16 %v819_v12, %v817_v11 }
 0x1e7   : > { %v858_v16 = vpack.c.bf16 %v820_v14, %v818_v13  ;;  %v740_v17 = vpop.f32.mrb[52].mxu0 }
 0x1e8   : > { %v741_v18 = vadd.f32 %v740_v17, %v2074_v21  ;;  %v742_v19 = vpop.f32.mrb[53].mxu0 }
 0x1e9   : > { %v743_v20 = vadd.f32 %v742_v19, %v2076_v22  ;;  %v744_v23 = vpop.f32.mrb[54].mxu0  ;;  %1128 = vmatprep.mubr.bf16.mxu1 %v858_v16 }
 0x1ea   : > { %v745_v24 = vadd.f32 %v744_v23, %v2074_v21  ;;  %v746_v25 = vpop.f32.mrb[55].mxu0  ;;  %1129 = vmatmul.mubr.bf16.gmra.mrb[48].mxu1 %v857_v15  ;;  %v821_v27 = vmax.f32 %v741_v18, 0.0 }
 0x1eb   : > { %v747_v26 = vadd.f32 %v746_v25, %v2076_v22  ;;  %v822_v29 = vmax.f32 %v743_v20, 0.0 }
 0x1ec   : > { %v823_v28 = vmax.f32 %v745_v24, 0.0 }
 0x1ed   : > { %v824_v30 = vmax.f32 %v747_v26, 0.0 }
 0x1ee   : > { %v859_v31 = vpack.c.bf16 %v823_v28, %v821_v27 }
 0x1ef   : > { %v860_v32 = vpack.c.bf16 %v824_v30, %v822_v29  ;;  %v750_v33 = vpop.f32.mrb[56].mxu0 }
 0x1f0   : > { %v751_v34 = vadd.f32 %v750_v33, %v2074_v21  ;;  %v752_v35 = vpop.f32.mrb[57].mxu0 }
 0x1f1   : > { %v753_v36 = vadd.f32 %v752_v35, %v2076_v22  ;;  %v754_v37 = vpop.f32.mrb[58].mxu0  ;;  %1136 = vmatprep.mubr.bf16.mxu1 %v860_v32 }
 0x1f2   : > { %v755_v38 = vadd.f32 %v754_v37, %v2074_v21  ;;  %v756_v39 = vpop.f32.mrb[59].mxu0  ;;  %1137 = vmatmul.mubr.bf16.gmra.mrb[52].mxu1 %v859_v31  ;;  %v825_v41 = vmax.f32 %v751_v34, 0.0 }
 0x1f3   : > { %v757_v40 = vadd.f32 %v756_v39, %v2076_v22  ;;  %v826_v43 = vmax.f32 %v753_v36, 0.0 }
 0x1f4   : > { %v827_v42 = vmax.f32 %v755_v38, 0.0 }
 0x1f5   : > { %v828_v44 = vmax.f32 %v757_v40, 0.0 }
 0x1f6   : > { %v861_v45 = vpack.c.bf16 %v827_v42, %v825_v41 }
 0x1f7   : > { %v862_v46 = vpack.c.bf16 %v828_v44, %v826_v43  ;;  %v760_v47 = vpop.f32.mrb[60].mxu0 }
 0x1f8   : > { %v761_v48 = vadd.f32 %v760_v47, %v2074_v21  ;;  %v762_v49 = vpop.f32.mrb[61].mxu0 }
 0x1f9   : > { %v763_v50 = vadd.f32 %v762_v49, %v2076_v22  ;;  %v764_v51 = vpop.f32.mrb[62].mxu0  ;;  %1144 = vmatprep.mubr.bf16.mxu1 %v862_v46 }
 0x1fa   : > { %v765_v52 = vadd.f32 %v764_v51, %v2074_v21  ;;  %v766_v53 = vpop.f32.mrb[63].mxu0  ;;  %1145 = vmatmul.mubr.bf16.gmra.mrb[56].mxu1 %v861_v45  ;;  %v829_v55 = vmax.f32 %v761_v48, 0.0 }
 0x1fb   : > { %v767_v54 = vadd.f32 %v766_v53, %v2076_v22  ;;  %v830_v57 = vmax.f32 %v763_v50, 0.0 }
 0x1fc   : > { %v831_v56 = vmax.f32 %v765_v52, 0.0 }
 0x1fd   : > { %v832_v58 = vmax.f32 %v767_v54, 0.0 }
 0x1fe   : > { %v863_v59 = vpack.c.bf16 %v831_v56, %v829_v55 }
 0x1ff   : > { %v864_v60 = vpack.c.bf16 %v832_v58, %v830_v57 }
 0x201   : > { %1152 = vmatprep.mubr.bf16.mxu1 %v864_v60 }
 0x202   : > { %1153 = vmatmul.mubr.bf16.gmra.mrb[60].mxu1 %v863_v59 }
 0x25d   : > { %v1386_v61 = vpop.f32.mrb[0].mxu1 }
 0x25e   : > { %v1387_v21 = vpop.f32.mrb[1].mxu1 }
 0x25f   : > { %v1388_v63 = vadd.f32 %v1387_v21, %v1386_v61  ;;  %v1389_v0 = vpop.f32.mrb[2].mxu1 }
 0x260   : > { %v1390_v1 = vpop.f32.mrb[3].mxu1 }
 0x261   : > { %v1035_v22 = vadd.f32 %v1388_v63, %v2146_v62  ;;  %v1391_v2 = vadd.f32 %v1390_v1, %v1389_v0 }
 0x263   : > { %1161 = vst [vmem:[%s2149_s13] sm:$0xff] %v1035_v22  ;;  %v1038_v3 = vadd.f32 %v1391_v2, %v2146_v62 }
 0x265   : > { %1162 = vst [vmem:[%s2149_s13 + $0x8] sm:$0xff] %v1038_v3  ;;  %v1392_v4 = vpop.f32.mrb[4].mxu1 }
 0x266   : > { %v1393_v5 = vpop.f32.mrb[5].mxu1 }
 0x267   : > { %v1394_v6 = vadd.f32 %v1393_v5, %v1392_v4  ;;  %v1395_v7 = vpop.f32.mrb[6].mxu1 }
 0x268   : > { %v1396_v8 = vpop.f32.mrb[7].mxu1 }
 0x269   : > { %v1043_v9 = vadd.f32 %v1394_v6, %v2146_v62  ;;  %v1397_v10 = vadd.f32 %v1396_v8, %v1395_v7 }
 0x26b   : > { %1163 = vst [vmem:[%s2149_s13 + $0x10] sm:$0xff] %v1043_v9  ;;  %v1046_v11 = vadd.f32 %v1397_v10, %v2146_v62 }
 0x26d   : > { %1164 = vst [vmem:[%s2149_s13 + $0x18] sm:$0xff] %v1046_v11  ;;  %v1398_v12 = vpop.f32.mrb[8].mxu1 }
 0x26e   : > { %v1399_v13 = vpop.f32.mrb[9].mxu1 }
 0x26f   : > { %v1400_v14 = vadd.f32 %v1399_v13, %v1398_v12  ;;  %v1401_v15 = vpop.f32.mrb[10].mxu1 }
 0x270   : > { %v1402_v16 = vpop.f32.mrb[11].mxu1 }
 0x271   : > { %v1051_v17 = vadd.f32 %v1400_v14, %v2146_v62  ;;  %v1403_v18 = vadd.f32 %v1402_v16, %v1401_v15 }
 0x273   : > { %1165 = vst [vmem:[%s2149_s13 + $0x20] sm:$0xff] %v1051_v17  ;;  %v1054_v19 = vadd.f32 %v1403_v18, %v2146_v62 }
 0x275   : > { %1166 = vst [vmem:[%s2149_s13 + $0x28] sm:$0xff] %v1054_v19  ;;  %v1404_v20 = vpop.f32.mrb[12].mxu1 }
 0x276   : > { %v1405_v23 = vpop.f32.mrb[13].mxu1 }
 0x277   : > { %v1406_v24 = vadd.f32 %v1405_v23, %v1404_v20  ;;  %v1407_v25 = vpop.f32.mrb[14].mxu1 }
 0x278   : > { %v1408_v26 = vpop.f32.mrb[15].mxu1 }
 0x279   : > { %v1059_v27 = vadd.f32 %v1406_v24, %v2146_v62  ;;  %v1409_v28 = vadd.f32 %v1408_v26, %v1407_v25 }
 0x27b   : > { %1167 = vst [vmem:[%s2149_s13 + $0x30] sm:$0xff] %v1059_v27  ;;  %v1062_v29 = vadd.f32 %v1409_v28, %v2146_v62 }
 0x27d   : > { %1168 = vst [vmem:[%s2149_s13 + $0x38] sm:$0xff] %v1062_v29  ;;  %v1410_v30 = vpop.f32.mrb[16].mxu1 }
 0x27e   : > { %v1411_v31 = vpop.f32.mrb[17].mxu1 }
 0x27f   : > { %v1412_v32 = vadd.f32 %v1411_v31, %v1410_v30  ;;  %v1413_v33 = vpop.f32.mrb[18].mxu1 }
 0x280   : > { %v1414_v34 = vpop.f32.mrb[19].mxu1 }
 0x281   : > { %v1067_v35 = vadd.f32 %v1412_v32, %v2146_v62  ;;  %v1415_v36 = vadd.f32 %v1414_v34, %v1413_v33 }
 0x283   : > { %1169 = vst [vmem:[%s2149_s13 + $0x40] sm:$0xff] %v1067_v35  ;;  %v1070_v37 = vadd.f32 %v1415_v36, %v2146_v62 }
 0x285   : > { %1170 = vst [vmem:[%s2149_s13 + $0x48] sm:$0xff] %v1070_v37  ;;  %v1416_v38 = vpop.f32.mrb[20].mxu1 }
 0x286   : > { %v1417_v39 = vpop.f32.mrb[21].mxu1 }
 0x287   : > { %v1418_v40 = vadd.f32 %v1417_v39, %v1416_v38  ;;  %v1419_v41 = vpop.f32.mrb[22].mxu1 }
 0x288   : > { %v1420_v42 = vpop.f32.mrb[23].mxu1 }
 0x289   : > { %v1075_v43 = vadd.f32 %v1418_v40, %v2146_v62  ;;  %v1421_v44 = vadd.f32 %v1420_v42, %v1419_v41 }
 0x28b   : > { %1171 = vst [vmem:[%s2149_s13 + $0x50] sm:$0xff] %v1075_v43  ;;  %v1078_v45 = vadd.f32 %v1421_v44, %v2146_v62 }
 0x28d   : > { %1172 = vst [vmem:[%s2149_s13 + $0x58] sm:$0xff] %v1078_v45  ;;  %v1422_v46 = vpop.f32.mrb[24].mxu1 }
 0x28e   : > { %v1423_v47 = vpop.f32.mrb[25].mxu1 }
 0x28f   : > { %v1424_v48 = vadd.f32 %v1423_v47, %v1422_v46  ;;  %v1425_v49 = vpop.f32.mrb[26].mxu1 }
 0x290   : > { %v1426_v50 = vpop.f32.mrb[27].mxu1 }
 0x291   : > { %v1083_v51 = vadd.f32 %v1424_v48, %v2146_v62  ;;  %v1427_v52 = vadd.f32 %v1426_v50, %v1425_v49 }
 0x293   : > { %1173 = vst [vmem:[%s2149_s13 + $0x60] sm:$0xff] %v1083_v51  ;;  %v1086_v53 = vadd.f32 %v1427_v52, %v2146_v62 }
 0x295   : > { %1174 = vst [vmem:[%s2149_s13 + $0x68] sm:$0xff] %v1086_v53  ;;  %v1428_v54 = vpop.f32.mrb[28].mxu1 }
 0x296   : > { %v1429_v55 = vpop.f32.mrb[29].mxu1 }
 0x297   : > { %v1430_v56 = vadd.f32 %v1429_v55, %v1428_v54  ;;  %v1431_v57 = vpop.f32.mrb[30].mxu1 }
 0x298   : > { %v1432_v58 = vpop.f32.mrb[31].mxu1 }
 0x299   : > { %v1091_v59 = vadd.f32 %v1430_v56, %v2146_v62  ;;  %v1433_v60 = vadd.f32 %v1432_v58, %v1431_v57 }
 0x29b   : > { %1175 = vst [vmem:[%s2149_s13 + $0x70] sm:$0xff] %v1091_v59  ;;  %v1094_v61 = vadd.f32 %v1433_v60, %v2146_v62 }
 0x29d   : > { %1176 = vst [vmem:[%s2149_s13 + $0x78] sm:$0xff] %v1094_v61  ;;  %v1434_v21 = vpop.f32.mrb[32].mxu1 }
 0x29e   : > { %v1435_v63 = vpop.f32.mrb[33].mxu1 }
 0x29f   : > { %v1436_v0 = vadd.f32 %v1435_v63, %v1434_v21  ;;  %v1437_v1 = vpop.f32.mrb[34].mxu1 }
 0x2a0   : > { %v1438_v22 = vpop.f32.mrb[35].mxu1 }
 0x2a1   : > { %v1099_v2 = vadd.f32 %v1436_v0, %v2146_v62  ;;  %v1439_v3 = vadd.f32 %v1438_v22, %v1437_v1 }
 0x2a3   : > { %1177 = vst [vmem:[%s2149_s13 + $0x80] sm:$0xff] %v1099_v2  ;;  %v1102_v4 = vadd.f32 %v1439_v3, %v2146_v62 }
 0x2a5   : > { %1178 = vst [vmem:[%s2149_s13 + $0x88] sm:$0xff] %v1102_v4  ;;  %v1440_v5 = vpop.f32.mrb[36].mxu1 }
 0x2a6   : > { %v1441_v6 = vpop.f32.mrb[37].mxu1 }
 0x2a7   : > { %v1442_v7 = vadd.f32 %v1441_v6, %v1440_v5  ;;  %v1443_v8 = vpop.f32.mrb[38].mxu1 }
 0x2a8   : > { %v1444_v9 = vpop.f32.mrb[39].mxu1 }
 0x2a9   : > { %v1107_v10 = vadd.f32 %v1442_v7, %v2146_v62  ;;  %v1445_v11 = vadd.f32 %v1444_v9, %v1443_v8 }
 0x2ab   : > { %1179 = vst [vmem:[%s2149_s13 + $0x90] sm:$0xff] %v1107_v10  ;;  %v1110_v12 = vadd.f32 %v1445_v11, %v2146_v62 }
 0x2ad   : > { %1180 = vst [vmem:[%s2149_s13 + $0x98] sm:$0xff] %v1110_v12  ;;  %v1446_v13 = vpop.f32.mrb[40].mxu1 }
 0x2ae   : > { %v1447_v14 = vpop.f32.mrb[41].mxu1 }
 0x2af   : > { %v1448_v15 = vadd.f32 %v1447_v14, %v1446_v13  ;;  %v1449_v16 = vpop.f32.mrb[42].mxu1 }
 0x2b0   : > { %v1450_v17 = vpop.f32.mrb[43].mxu1 }
 0x2b1   : > { %v1115_v18 = vadd.f32 %v1448_v15, %v2146_v62  ;;  %v1451_v19 = vadd.f32 %v1450_v17, %v1449_v16 }
 0x2b3   : > { %1181 = vst [vmem:[%s2149_s13 + $0xa0] sm:$0xff] %v1115_v18  ;;  %v1118_v20 = vadd.f32 %v1451_v19, %v2146_v62 }
 0x2b5   : > { %1182 = vst [vmem:[%s2149_s13 + $0xa8] sm:$0xff] %v1118_v20  ;;  %v1452_v23 = vpop.f32.mrb[44].mxu1 }
 0x2b6   : > { %v1453_v24 = vpop.f32.mrb[45].mxu1 }
 0x2b7   : > { %v1454_v25 = vadd.f32 %v1453_v24, %v1452_v23  ;;  %v1455_v26 = vpop.f32.mrb[46].mxu1 }
 0x2b8   : > { %v1456_v27 = vpop.f32.mrb[47].mxu1 }
 0x2b9   : > { %v1123_v28 = vadd.f32 %v1454_v25, %v2146_v62  ;;  %v1457_v29 = vadd.f32 %v1456_v27, %v1455_v26 }
 0x2bb   : > { %1183 = vst [vmem:[%s2149_s13 + $0xb0] sm:$0xff] %v1123_v28  ;;  %v1126_v30 = vadd.f32 %v1457_v29, %v2146_v62 }
 0x2bd   : > { %1184 = vst [vmem:[%s2149_s13 + $0xb8] sm:$0xff] %v1126_v30  ;;  %v1458_v31 = vpop.f32.mrb[48].mxu1 }
 0x2be   : > { %v1459_v32 = vpop.f32.mrb[49].mxu1 }
 0x2bf   : > { %v1460_v33 = vadd.f32 %v1459_v32, %v1458_v31  ;;  %v1461_v34 = vpop.f32.mrb[50].mxu1 }
 0x2c0   : > { %v1462_v35 = vpop.f32.mrb[51].mxu1 }
 0x2c1   : > { %v1131_v36 = vadd.f32 %v1460_v33, %v2146_v62  ;;  %v1463_v37 = vadd.f32 %v1462_v35, %v1461_v34 }
 0x2c3   : > { %1185 = vst [vmem:[%s2149_s13 + $0xc0] sm:$0xff] %v1131_v36  ;;  %v1134_v38 = vadd.f32 %v1463_v37, %v2146_v62 }
 0x2c5   : > { %1186 = vst [vmem:[%s2149_s13 + $0xc8] sm:$0xff] %v1134_v38  ;;  %v1464_v39 = vpop.f32.mrb[52].mxu1 }
 0x2c6   : > { %v1465_v40 = vpop.f32.mrb[53].mxu1 }
 0x2c7   : > { %v1466_v41 = vadd.f32 %v1465_v40, %v1464_v39  ;;  %v1467_v42 = vpop.f32.mrb[54].mxu1 }
 0x2c8   : > { %v1468_v43 = vpop.f32.mrb[55].mxu1 }
 0x2c9   : > { %v1139_v44 = vadd.f32 %v1466_v41, %v2146_v62  ;;  %v1469_v45 = vadd.f32 %v1468_v43, %v1467_v42 }
 0x2cb   : > { %1187 = vst [vmem:[%s2149_s13 + $0xd0] sm:$0xff] %v1139_v44  ;;  %v1142_v46 = vadd.f32 %v1469_v45, %v2146_v62 }
 0x2cd   : > { %1188 = vst [vmem:[%s2149_s13 + $0xd8] sm:$0xff] %v1142_v46  ;;  %v1470_v47 = vpop.f32.mrb[56].mxu1 }
 0x2ce   : > { %v1471_v48 = vpop.f32.mrb[57].mxu1 }
 0x2cf   : > { %v1472_v49 = vadd.f32 %v1471_v48, %v1470_v47  ;;  %v1473_v50 = vpop.f32.mrb[58].mxu1 }
 0x2d0   : > { %v1474_v51 = vpop.f32.mrb[59].mxu1 }
 0x2d1   : > { %v1147_v52 = vadd.f32 %v1472_v49, %v2146_v62  ;;  %v1475_v53 = vadd.f32 %v1474_v51, %v1473_v50 }
 0x2d3   : > { %1189 = vst [vmem:[%s2149_s13 + $0xe0] sm:$0xff] %v1147_v52  ;;  %v1150_v54 = vadd.f32 %v1475_v53, %v2146_v62 }
 0x2d5   : > { %1190 = vst [vmem:[%s2149_s13 + $0xe8] sm:$0xff] %v1150_v54  ;;  %v1476_v55 = vpop.f32.mrb[60].mxu1 }
 0x2d6   : > { %v1477_v56 = vpop.f32.mrb[61].mxu1 }
 0x2d7   : > { %v1478_v57 = vadd.f32 %v1477_v56, %v1476_v55  ;;  %v1479_v58 = vpop.f32.mrb[62].mxu1 }
 0x2d8   : > { %v1480_v59 = vpop.f32.mrb[63].mxu1 }
 0x2d9   : > { %v1155_v60 = vadd.f32 %v1478_v57, %v2146_v62  ;;  %v1481_v61 = vadd.f32 %v1480_v59, %v1479_v58 }
 0x2db   : > { %1191 = vst [vmem:[%s2149_s13 + $0xf0] sm:$0xff] %v1155_v60  ;;  %v1158_v21 = vadd.f32 %v1481_v61, %v2146_v62 }
 0x2dd   : > { %1192 = vst [vmem:[%s2149_s13 + $0xf8] sm:$0xff] %v1158_v21 }
 0x2de   : > { %1720 = shalt.err (!%p1717_p2)
}
 0x2df   : > { %s1721_s24 = scalar_lea.hbm %s2216_s14, 4096  ;;  %s1725_s28 = scalar_lea.hbm %s2270_s5, 8192 }
 0x2e0   : > { %p1722_p13 = scmp.ne.s32.totalorder %s2216_s14, %s1721_s24  ;;  %p1726_p4 = scmp.lt.u32.totalorder %s2216_s14, %s2270_s5 }
 0x2e1   : > { %p1727_p7 = scmp.lt.u32.totalorder %s1725_s28, %s1721_s24  ;;  %p1729_p11 = scmp.lt.u32.totalorder %s1721_s24, %s2216_s14 }
 0x2e2   : > { %p1723_p6 = pnand %p1722_p13, %p2284_p0 }
 0x2e3   : > { %p1728_p8 = por %p1727_p7, %p1726_p4 }
 0x2e4   : > { %p1724_p10 = pneg %p1723_p6 }
 0x2e5   : > { %p1730_p1 = por %p1729_p11, %p1728_p8 }
 0x2e7   : > { %p1731_p3 = pnand %p1730_p1, %p1724_p10 }
 0x2e9   : > { %1734 = shalt.err (!%p1731_p3)
}
 0x2ea   : > { %s1789_s29 = smov 128   ;;  %s1790_s9 = smov 8  }
 0x2eb   : > { %1492 = dma.vmem_to_hbm [thread:$0]  (%p2284_p0), %s2218_s8, 4096, %s2216_s14, %s1194_s22, %s1789_s29, %s1789_s29, %s1790_s9  }
 0x2ec PF: > { %s1222_s11 = sand.u32 1, %s1765_s18   ;;  %p2285_p5 = scmp.ne.s32.totalorder %s2275_s25, 0 }
 0x2ed   : > { %p2286_p9 = scmp.ge.s32.totalorder %s1777_s21, 2  ;;  %s1223_s15 = scalar_lea.sflag [#allocation4], %s1222_s11 }
 0x2ef   : > { %p1506_p12 = pnand %p2286_p9, %p2285_p5 }
 0x2f1   : > { %1760 = dma.done.wait (!%p1506_p12), %s1223_s15, 4096  }
 0x2f2   : > { %1762 = vsyncadd (!%p1506_p12), %s1223_s15, 4294963200  ;;  %p19_p2 = scmp.ge.s32.totalorder %s1931_s16, 4   ;;  %s2287_s18 = smov %s1769_s19 }
 0x2f3   : > { %s2288_s19 = smov %s1773_s20  ;;  %s2289_s20 = smov %s1940_s27 }
 0x2f4   : > { %s2290_s21 = smov %s1931_s16  ;;  %21 = sbr.rel (!%p19_p2) target bundleno = 6 (0x6), region = 93 }
 0x2fb   :  { %1228 = vsyncpa [#allocation3], 1 }
 0x2fc   :  { %1230 = vsyncpa [#allocation3 + $0x1], 1 }
 0x2fd   :  { %1231 = vsyncpa [#allocation6], 1 }
 0x2fe   :  { %1232 = vsyncpa [#allocation4], 1 }
 0x2ff   :  { %1234 = vsyncpa [#allocation4 + $0x1], 1 }

</bundles_post_ra>
